<compile_context>
chip_gen: v7x
topology: tpu7x:2x2x1
jax: 0.10.0
libtpu: 0.0.40
codegen_flags: <defaults>
</compile_context>

<pallas_src>
import functools

import jax
import jax.numpy as jnp
from jax import lax
from jax.experimental import pallas as pl
from jax.experimental.pallas import tpu as pltpu


def _pad_bounds(dtype):
    """(-inf, +inf) for floats; (iinfo.min, iinfo.max) for integer dtypes."""
    dtype = jnp.dtype(dtype)
    if jnp.issubdtype(dtype, jnp.floating):
        return float("-inf"), float("inf")
    info = jnp.iinfo(dtype)
    return int(info.min), int(info.max)


def _boundary_bias(H, W, dtype):
    """(2, H*W) bias rows: row0 kills wrapped 'w-1' lanes, row1 kills 'w+1'."""
    neg, pos = _pad_bounds(dtype)
    col = jnp.arange(H * W, dtype=jnp.int32) % W
    row0 = jnp.where(col == 0, neg, pos)
    row1 = jnp.where(col == W - 1, neg, pos)
    return jnp.stack([row0, row1]).astype(dtype)


def _make_kernel(H, W):
    HW = H * W

    def kernel(x_ref, bias_ref, o_ref):
        x = x_ref[...]                                   # (BC, HW)

        # ---- pool along W: lane rolls by +-1; neutralize wrapped lanes ----
        prev_w = jnp.minimum(pltpu.roll(x, 1, 1), bias_ref[0:1, :])
        next_w = jnp.minimum(pltpu.roll(x, HW - 1, 1), bias_ref[1:2, :])
        row_max = jnp.maximum(jnp.maximum(prev_w, x), next_w)

        if H == 1:                                       # trace-time branch
            o_ref[...] = row_max.astype(o_ref.dtype)
            return

        # ---- pool along H: lane rolls by +-W, unmasked ----
        prev_h = pltpu.roll(row_max, W, 1)
        next_h = pltpu.roll(row_max, HW - W, 1)
        out = jnp.maximum(jnp.maximum(prev_h, row_max), next_h)
        o_ref[...] = out.astype(o_ref.dtype)

        # ---- patch the two H-edge rows (contiguous strips, tiny) ----
        top = jnp.maximum(row_max[:, 0:W], row_max[:, W:2 * W])
        o_ref[:, 0:W] = top.astype(o_ref.dtype)
        bot = jnp.maximum(row_max[:, (H - 2) * W:(H - 1) * W],
                          row_max[:, (H - 1) * W:HW])
        o_ref[:, (H - 1) * W:HW] = bot.astype(o_ref.dtype)

    return kernel


def _choose_block_rows(nc, hw, itemsize, target_bytes):
    """Rows per block: ~target_bytes per block, sublane-aligned."""
    sub = max(8, 32 // itemsize)           # f32 -> 8, bf16 -> 16, int8 -> 32
    bc = max(1, target_bytes // (hw * itemsize))
    if bc >= nc:
        return nc                          # block dim equals full array dim
    bc = max(sub, (bc // sub) * sub)
    return min(bc, nc)


@functools.partial(jax.jit, static_argnames=("target_block_bytes",))
def maxpool3x3(x, *, target_block_bytes=1 << 20):
    """nn.MaxPool2d(kernel_size=3, stride=1, padding=1) on an NCHW tensor."""
    N, C, H, W = x.shape
    NC, HW = N * C, H * W
    xr = x.reshape(NC, HW)                         # lane-dense, free reshape
    bias = _boundary_bias(H, W, x.dtype)           # (2, HW), resident in VMEM

    bc = _choose_block_rows(NC, HW, x.dtype.itemsize, target_block_bytes)
    grid = (pl.cdiv(NC, bc),)

    out = pl.pallas_call(
        _make_kernel(H, W),
        out_shape=jax.ShapeDtypeStruct((NC, HW), x.dtype),
        grid=grid,
        in_specs=[pl.BlockSpec((bc, HW), lambda i: (i, 0)),
                  pl.BlockSpec((2, HW), lambda i: (0, 0))],
        out_specs=pl.BlockSpec((bc, HW), lambda i: (i, 0)),
        compiler_params=pltpu.CompilerParams(
            dimension_semantics=("parallel",)),
    )(xr, bias)
    return out.reshape(N, C, H, W)


def _reference_maxpool3x3(x):
    # Pure-JAX reference matching nn.MaxPool2d(3, 1, 1) semantics (-inf padding).
    return lax.reduce_window(
        x, jnp.array(-jnp.inf, dtype=x.dtype), lax.max,
        window_dimensions=(1, 1, 3, 3),
        window_strides=(1, 1, 1, 1),
        padding=((0, 0), (0, 0), (1, 1), (1, 1)),
    )


if __name__ == "__main__":
    # MaxPool3x3(in_channels=4, out_channels=4): parameter-free, channel-preserving.
    key = jax.random.PRNGKey(0)
    x = jax.random.normal(key, (2, 4, 16, 16), dtype=jnp.float32)

    out = jax.block_until_ready(maxpool3x3(x))
    ref = _reference_maxpool3x3(x)
    assert out.shape == ref.shape and out.dtype == ref.dtype
    assert jnp.array_equal(out, ref), "Pallas maxpool mismatch vs reference (f32)"

    # bf16 path (halves HBM bytes; max-pool is selection-only so results are exact).
    xb = x.astype(jnp.bfloat16)
    outb = jax.block_until_ready(maxpool3x3(xb))
    assert jnp.array_equal(outb, _reference_maxpool3x3(xb)), "bf16 mismatch"

    # Multi-block + remainder path: NC=15 rows with a small block -> grid of 2.
    x2 = jax.random.normal(jax.random.PRNGKey(1), (3, 5, 32, 32), dtype=jnp.float32)
    out2 = jax.block_until_ready(maxpool3x3(x2, target_block_bytes=32 * 1024))
    assert jnp.array_equal(out2, _reference_maxpool3x3(x2)), "multi-block mismatch"

    print("KERNEL_OK")
</pallas_src>

<mosaic_0001>
module attributes {stable_mosaic.version = 11 : i64} {
  func.func @kernel(%arg0: i32, %arg1: memref<8x256xf32, #tpu.memory_space<vmem>>, %arg2: memref<2x256xf32, #tpu.memory_space<vmem>>, %arg3: memref<8x256xf32, #tpu.memory_space<vmem>>) attributes {dimension_semantics = [#tpu.dimension_semantics<parallel>], iteration_bounds = array<i64: 1>, scalar_prefetch = 0 : i64, scratch_operands = 0 : i64, tpu.core_type = #tpu.core_type<tc>, window_params = [{transform_indices = @transform_0, window_bounds = array<i64: 8, 256>}, {pipeline_mode = #tpu.pipeline_mode<synchronous>, transform_indices = @transform_1, window_bounds = array<i64: 2, 256>}, {transform_indices = @transform_2, window_bounds = array<i64: 8, 256>}]} {
    %c0 = arith.constant 0 : index
    %c0_0 = arith.constant 0 : index
    %0 = vector.load %arg1[%c0, %c0_0] : memref<8x256xf32, #tpu.memory_space<vmem>>, vector<8x256xf32>
    %c1_i32 = arith.constant 1 : i32
    %1 = tpu.dynamic_rotate %0 by %c1_i32 dim 1 : vector<8x256xf32>, i32 -> vector<8x256xf32>
    %c0_1 = arith.constant 0 : index
    %c0_2 = arith.constant 0 : index
    %2 = vector.load %arg2[%c0_1, %c0_2] : memref<2x256xf32, #tpu.memory_space<vmem>>, vector<1x256xf32>
    %3 = vector.broadcast %2 : vector<1x256xf32> to vector<8x256xf32>
    %4 = arith.minimumf %1, %3 : vector<8x256xf32>
    %c255_i32 = arith.constant 255 : i32
    %5 = tpu.dynamic_rotate %0 by %c255_i32 dim 1 : vector<8x256xf32>, i32 -> vector<8x256xf32>
    %c1 = arith.constant 1 : index
    %c0_3 = arith.constant 0 : index
    %6 = vector.load %arg2[%c1, %c0_3] : memref<2x256xf32, #tpu.memory_space<vmem>>, vector<1x256xf32>
    %7 = vector.broadcast %6 : vector<1x256xf32> to vector<8x256xf32>
    %8 = arith.minimumf %5, %7 : vector<8x256xf32>
    %9 = arith.maximumf %4, %0 : vector<8x256xf32>
    %10 = arith.maximumf %9, %8 : vector<8x256xf32>
    %c16_i32 = arith.constant 16 : i32
    %11 = tpu.dynamic_rotate %10 by %c16_i32 dim 1 : vector<8x256xf32>, i32 -> vector<8x256xf32>
    %c240_i32 = arith.constant 240 : i32
    %12 = tpu.dynamic_rotate %10 by %c240_i32 dim 1 : vector<8x256xf32>, i32 -> vector<8x256xf32>
    %13 = arith.maximumf %11, %10 : vector<8x256xf32>
    %14 = arith.maximumf %13, %12 : vector<8x256xf32>
    %c0_4 = arith.constant 0 : index
    %c0_5 = arith.constant 0 : index
    %15 = vector.load %arg3[%c0_4, %c0_5] : memref<8x256xf32, #tpu.memory_space<vmem>>, vector<8x256xf32>
    tpu.vector_store %arg3[%c0_4, %c0_5], %14 {strides = array<i32>} : memref<8x256xf32, #tpu.memory_space<vmem>>, vector<8x256xf32>,
    %16 = vector.extract_strided_slice %10 {offsets = [0, 0], sizes = [8, 16], strides = [1, 1]} : vector<8x256xf32> to vector<8x16xf32>
    %17 = vector.extract_strided_slice %10 {offsets = [0, 16], sizes = [8, 16], strides = [1, 1]} : vector<8x256xf32> to vector<8x16xf32>
    %18 = arith.maximumf %16, %17 : vector<8x16xf32>
    %c0_6 = arith.constant 0 : index
    %c0_7 = arith.constant 0 : index
    %19 = vector.load %arg3[%c0_6, %c0_7] : memref<8x256xf32, #tpu.memory_space<vmem>>, vector<8x16xf32>
    tpu.vector_store %arg3[%c0_6, %c0_7], %18 {strides = array<i32>} : memref<8x256xf32, #tpu.memory_space<vmem>>, vector<8x16xf32>,
    %20 = vector.extract_strided_slice %10 {offsets = [0, 224], sizes = [8, 16], strides = [1, 1]} : vector<8x256xf32> to vector<8x16xf32>
    %21 = vector.extract_strided_slice %10 {offsets = [0, 240], sizes = [8, 16], strides = [1, 1]} : vector<8x256xf32> to vector<8x16xf32>
    %22 = arith.maximumf %20, %21 : vector<8x16xf32>
    %c0_8 = arith.constant 0 : index
    %c240 = arith.constant 240 : index
    %23 = vector.load %arg3[%c0_8, %c240] : memref<8x256xf32, #tpu.memory_space<vmem>>, vector<8x16xf32>
    tpu.vector_store %arg3[%c0_8, %c240], %22 {strides = array<i32>} : memref<8x256xf32, #tpu.memory_space<vmem>>, vector<8x16xf32>,
    return
  }
  func.func @transform_0(%arg0: i32) -> (i32, i32) {
    %c0_i32 = arith.constant 0 : i32
    %c0_i32_0 = arith.constant 0 : i32
    return %arg0, %c0_i32 : i32, i32
  }
  func.func @transform_1(%arg0: i32) -> (i32, i32) {
    %c0_i32 = arith.constant 0 : i32
    %c0_i32_0 = arith.constant 0 : i32
    %c0_i32_1 = arith.constant 0 : i32
    return %c0_i32, %c0_i32_0 : i32, i32
  }
  func.func @transform_2(%arg0: i32) -> (i32, i32) {
    %c0_i32 = arith.constant 0 : i32
    %c0_i32_0 = arith.constant 0 : i32
    return %arg0, %c0_i32 : i32, i32
  }
}

</mosaic_0001>

<bundles_post_ra>
// kernel: maxpool3x3.1
= control target key start
LH: loop header
LB: loop body
LE: loop exit
PB: predicated region body
PF: predicated region fallthrough
CT: control target
= control target key end

     0   :  { %s109_s11 = smov 127   ;;  %s110_s12 = smov 1   ;;  %v17_v2 = vlaneseq  ;;  %vm87_vm4 = vcmask 130048   ;;  %vm98_vm5 = vcmask 1048448   ;;  %s152_s0 = inlined_call_operand.vmem [shape: f32[8,256], index: 0, kind: input, shape index: {}]   ;;  %s153_s1 = inlined_call_operand.vmem [shape: f32[2,256], index: 1, kind: input, shape index: {}]   ;;  %s154_s2 = inlined_call_operand.vmem [shape: f32[8,256], index: 2, kind: output, shape index: {}]  }
   0x1   :  { %v11_v0 = vld [vmem:[%s152_s0] sm:$0xff]  ;;  %v12_v1 = vld [vmem:[%s152_s0 + $0x8] sm:$0xff]  ;;  %s111_s0 = smov 16  }
   0x2   :  { %36 = vrot.lane.b32.xlu1 %v11_v0, %s109_s11  ;;  %13 = vrot.lane.b32.xlu0 %v11_v0, %s110_s12  ;;  %v25_v3 = vshrl.u32 %v17_v2, 7  ;;  %v18_v4 = vand.u32 127, %v17_v2  ;;  %v22_v7 = vld [vmem:[%s153_s1] ss:$2 sm:$0x3] }
   0x3   :  { %v104_v10 = vld [vmem:[%s153_s1 + $0x1] ss:$2 sm:$0x3]  ;;  %s112_s1 = smov 112  }
   0x4   :  { %v26_v5 = vsub.s32 0, %v25_v3  ;;  %v30_v6 = vsub.s32 1, %v25_v3  ;;  %vm40_vm0 = vcmp.lt.s32.totalorder %v18_v4, 127  ;;  %vm19_vm1 = vcmp.lt.s32.totalorder %v18_v4, 1 }
   0x5   :  { %vm66_vm2 = vcmp.lt.s32.totalorder %v18_v4, 16  ;;  %vm73_vm3 = vcmp.lt.s32.totalorder %v18_v4, 112 }
   0x6   :  { %38 = vrot.lane.b32.xlu1 %v12_v1, %s109_s11  ;;  %15 = vrot.lane.b32.xlu0 %v12_v1, %s110_s12  ;;  %v27_v11 = vrot.slane %v22_v7, %v26_v5  ;;  %v31_v12 = vrot.slane %v22_v7, %v30_v6  ;;  %v49_v13 = vrot.slane %v104_v10, %v26_v5 }
   0x7   :  { %v53_v14 = vrot.slane %v104_v10, %v30_v6 }
  0x74   :  { %v37_v8 = vpop.permute.xlu1 %36  ;;  %v14_v9 = vpop.permute.xlu0 %13 }
  0x78   :  { %v39_v15 = vpop.permute.xlu1 %38  ;;  %v16_v16 = vpop.permute.xlu0 %15 }
  0x79   :  { %v41_v17 = vsel %vm40_vm0, %v37_v8, %v39_v15  ;;  %v42_v18 = vsel %vm40_vm0, %v39_v15, %v37_v8  ;;  %v20_v19 = vsel %vm19_vm1, %v14_v9, %v16_v16  ;;  %v21_v20 = vsel %vm19_vm1, %v16_v16, %v14_v9 }
  0x7a   :  { %v34_v21 = vmin.f32 %v21_v20, %v27_v11  ;;  %v35_v22 = vmin.f32 %v20_v19, %v31_v12  ;;  %v56_v23 = vmin.f32 %v41_v17, %v49_v13  ;;  %v57_v24 = vmin.f32 %v42_v18, %v53_v14 }
  0x7c   :  { %v58_v25 = vmax.f32 %v34_v21, %v11_v0  ;;  %v59_v26 = vmax.f32 %v35_v22, %v12_v1 }
  0x7e   :  { %v60_v27 = vmax.f32 %v58_v25, %v56_v23  ;;  %v61_v28 = vmax.f32 %v59_v26, %v57_v24 }
  0x80   :  { %62 = vrot.lane.b32.xlu1 %v60_v27, %s111_s0  ;;  %90 = vrot.lane.b32.xlu0 %v61_v28, %s112_s1 }
  0x84   :  { %69 = vrot.lane.b32.xlu1 %v60_v27, %s112_s1  ;;  %64 = vrot.lane.b32.xlu0 %v61_v28, %s111_s0 }
  0x88   :  { %83 = vrot.lane.b32.xlu1 %v60_v27, %s112_s1  ;;  %71 = vrot.lane.b32.xlu0 %v61_v28, %s112_s1 }
  0xf2   :  { %v63_v29 = vpop.permute.xlu1 %62  ;;  %v91_v30 = vpop.permute.xlu0 %90 }
  0xf3   :  { %v93_v31 = vmax.f32 %v61_v28, %v91_v30 }
  0xf5   :  { %95 = vrot.lane.b32.xlu0 %v93_v31, %s111_s0 }
  0xf6   :  { %v70_v32 = vpop.permute.xlu1 %69  ;;  %v65_v33 = vpop.permute.xlu0 %64 }
  0xf7   :  { %v67_v34 = vsel %vm66_vm2, %v63_v29, %v65_v33  ;;  %v68_v35 = vsel %vm66_vm2, %v65_v33, %v63_v29 }
  0xf8   :  { %v76_v36 = vmax.f32 %v68_v35, %v60_v27  ;;  %v77_v37 = vmax.f32 %v67_v34, %v61_v28 }
  0xfa   :  { %v84_v38 = vpop.permute.xlu1 %83  ;;  %v72_v39 = vpop.permute.xlu0 %71 }
  0xfb   :  { %v74_v40 = vsel %vm73_vm3, %v70_v32, %v72_v39  ;;  %v75_v41 = vsel %vm73_vm3, %v72_v39, %v70_v32  ;;  %v86_v44 = vmax.f32 %v60_v27, %v84_v38 }
  0xfc   :  { %v78_v42 = vmax.f32 %v76_v36, %v74_v40  ;;  %v79_v43 = vmax.f32 %v77_v37, %v75_v41 }
  0xfe   :  { %80 = vst [vmem:[%s154_s2] sm:$0xff] %v78_v42  ;;  %81 = vst [vmem:[%s154_s2 + $0x8] sm:$0xff] %v79_v43 }
  0xff   :  { %88 = vst.msk [vmem:[%s154_s2] sm:$0xff] %vm87_vm4, %v86_v44 }
 0x167   :  { %v96_v45 = vpop.permute.xlu0 %95 }
 0x168   :  { %99 = vst.msk [vmem:[%s154_s2 + $0x8] sm:$0xff] %vm98_vm5, %v96_v45 }

</bundles_post_ra>
